<compile_context>
chip_gen: v6e
topology: v6e:2x2x1
jax: 0.10.0
libtpu: 0.0.40
codegen_flags: <defaults>
</compile_context>

<pallas_src>
import functools
import math

import jax
import jax.numpy as jnp
from jax.experimental import pallas as pl
from jax.experimental.pallas import tpu as pltpu


def _ohem_ce_kernel(thresh, ignore_index, hw, tile_hw, tiles_per_split, needs_mask,
                    logits_ref, labels_ref, loss_ref, acc_ref):
    # Zero this (batch, split) pair's accumulator row on its first pixel tile.
    @pl.when(pl.program_id(2) == 0)
    def _():
        acc_ref[...] = jnp.zeros_like(acc_ref)

    x = logits_ref[...].astype(jnp.float32)     # (1, C, T)  classes on sublanes
    lab = labels_ref[...].astype(jnp.int32)     # (1, 1, T)  widened in-kernel

    # Numerically stable cross-entropy with a single pass over the (C, T) slab:
    # xm = x - max is reused both for exp() and for the label gather, so the
    # max-shift cancels:  loss = log(sum exp(xm)) - xm[label].
    m = jnp.max(x, axis=1, keepdims=True)                                # (1, 1, T)
    xm = x - m                                                           # (1, C, T)
    sum_exp = jnp.sum(jnp.exp(xm), axis=1, keepdims=True)                # (1, 1, T)
    cls = jax.lax.broadcasted_iota(jnp.int32, x.shape, 1)                # (1, C, T)
    xm_lab = jnp.sum(jnp.where(cls == lab, xm, 0.0), axis=1, keepdims=True)

    valid = lab != ignore_index                                          # (1, 1, T)
    if needs_mask:
        # Tail tile: lanes past the end of the image read unspecified data;
        # mask them out of the store and all three reductions.
        block_idx = pl.program_id(1) * tiles_per_split + pl.program_id(2)
        lane = jax.lax.broadcasted_iota(jnp.int32, valid.shape, 2)
        valid = valid & ((block_idx * tile_hw + lane) < hw)

    loss = jnp.where(valid, jnp.log(sum_exp) - xm_lab, 0.0)              # CE, ignore -> 0
    loss_ref[...] = loss.astype(loss_ref.dtype)                          # lane-dense store

    hard = loss > thresh
    sumh = jnp.sum(jnp.where(hard, loss, 0.0), axis=2, keepdims=True)    # (1, 1, 1)
    cnth = jnp.sum(hard.astype(jnp.float32), axis=2, keepdims=True)
    cntv = jnp.sum(valid.astype(jnp.float32), axis=2, keepdims=True)

    # Pack the three running scalars into lanes 0/1/2 of one (1, 1, 128) block.
    # TODO(synk): the 125 spare lanes could hold an in-kernel loss histogram to
    # compute the top-n_min threshold and drop the per-pixel loss writeback.
    lane = jax.lax.broadcasted_iota(jnp.int32, acc_ref.shape, 2)
    acc_ref[...] += (jnp.where(lane == 0, sumh, 0.0)
                     + jnp.where(lane == 1, cnth, 0.0)
                     + jnp.where(lane == 2, cntv, 0.0))


def _vmem_budget_bytes():
    """Generation-aware (tile-sizing budget, compiler scoped VMEM limit)."""
    try:
        capacity = int(pltpu.get_tpu_info().vmem_capacity_bytes)
    except Exception:
        capacity = 64 << 20          # unknown: assume the smallest (v7x, 64 MiB)
    if capacity <= (64 << 20):       # v7x: 64 MiB physical per TensorCore
        return 32 << 20, 48 << 20
    return 64 << 20, 96 << 20        # v5e / v6e: 128 MiB physical


def _pick_tile_hw(hw, c, in_itemsize, lab_itemsize, out_itemsize,
                  vmem_budget, target_step_bytes=4 << 20):
    """Largest lane tile (multiple of 128) giving >= ~4 MiB of HBM traffic per
    grid step while fitting the per-generation VMEM budget."""
    hbm_per_pixel = c * in_itemsize + lab_itemsize + out_itemsize
    # double-buffered pipeline blocks + f32 temporaries (x, exp(xm), iota/one-hot)
    vmem_per_pixel = 2 * hbm_per_pixel + 6 * c * 4 + 64
    cap = min(target_step_bytes // hbm_per_pixel, vmem_budget // vmem_per_pixel)
    cap = max(128, (cap // 128) * 128)
    if hw <= 128:
        return hw                     # block last dim == full array dim: always legal
    return min(cap, (hw // 128) * 128)


def ohem_ce_loss(logits_nchw, labels, *, thresh=0.7, ignore_index=255,
                 tile_hw=None, pixel_splits=2, loss_dtype=jnp.bfloat16):
    n, c, h, w = logits_nchw.shape
    hw = h * w
    p = n * hw

    # NCHW -> (N, C, H*W): free reshape, pixels on lanes, classes on sublanes.
    # Labels keep the caller's dtype (int32 / int16 / uint8 accepted) and are
    # widened inside the kernel, so narrow label dtypes shrink the HBM stream.
    logits_r = logits_nchw.reshape(n, c, hw)
    labels_r = labels.reshape(n, 1, hw)

    in_item = jnp.dtype(logits_r.dtype).itemsize
    lab_item = jnp.dtype(labels_r.dtype).itemsize
    out_item = jnp.dtype(loss_dtype).itemsize

    vmem_budget, vmem_limit = _vmem_budget_bytes()
    if tile_hw is None:
        tile_hw = _pick_tile_hw(hw, c, in_item, lab_item, out_item, vmem_budget)
    assert tile_hw == hw or (tile_hw % 128 == 0 and tile_hw <= hw)

    total_tiles = int(pl.cdiv(hw, tile_hw))
    # Second "parallel" grid axis over pixels: keeps both v7x TensorCores busy
    # even when N == 1; no effect on single-TC v5e/v6e.
    n_splits = pixel_splits if (pixel_splits > 1 and total_tiles % pixel_splits == 0) else 1
    tiles_per_split = total_tiles // n_splits
    needs_mask = (hw % tile_hw) != 0

    thresh_val = -math.log(thresh)    # self.thresh = -log(thresh) in the module

    kernel = functools.partial(_ohem_ce_kernel, thresh_val, ignore_index,
                               hw, tile_hw, tiles_per_split, needs_mask)

    loss, acc = pl.pallas_call(
        kernel,
        out_shape=(
            jax.ShapeDtypeStruct((n, 1, hw), loss_dtype),                 # per-pixel loss
            jax.ShapeDtypeStruct((n * n_splits, 1, 128), jnp.float32),    # packed accumulators
        ),
        grid_spec=pltpu.PrefetchScalarGridSpec(
            num_scalar_prefetch=0,
            grid=(n, n_splits, tiles_per_split),
            in_specs=[
                pl.BlockSpec((1, c, tile_hw),
                             lambda b, s, t: (b, 0, s * tiles_per_split + t)),
                pl.BlockSpec((1, 1, tile_hw),
                             lambda b, s, t: (b, 0, s * tiles_per_split + t)),
            ],
            out_specs=[
                pl.BlockSpec((1, 1, tile_hw),
                             lambda b, s, t: (b, 0, s * tiles_per_split + t)),
                pl.BlockSpec((1, 1, 128),
                             lambda b, s, t: (b * n_splits + s, 0, 0)),
            ],
        ),
        compiler_params=pltpu.CompilerParams(
            dimension_semantics=("parallel", "parallel", "arbitrary"),
            vmem_limit_bytes=vmem_limit),
    )(logits_r, labels_r)

    totals = jnp.sum(acc[:, 0, :], axis=0)                 # sum per-(batch,split) rows
    sum_hard, n_hard, n_valid = totals[0], totals[1], totals[2]

    # n_min = (# non-ignored labels) // 16
    n_min = jnp.floor(n_valid / 16.0)

    def _mean_hard(_):
        # Enough hard examples: mean over losses above the threshold, assembled
        # entirely from the in-kernel f32 accumulators (no extra HBM pass).
        return sum_hard / jnp.maximum(n_hard, 1.0)

    def _mean_topk(_):
        # Fallback: mean of the top-n_min losses.  n_min <= P // 16, so a static
        # top_k(P // 16) + short cumsum covers every dynamic n_min (no full sort).
        # TODO(synk): dynamic-size boolean indexing / dynamic-k topk have no
        # static-shape Pallas equivalent; this fallback is assembled in plain JAX.
        k = max(1, p // 16)
        vals = jax.lax.top_k(loss.reshape(-1).astype(jnp.float32), k)[0]
        cum = jnp.cumsum(vals)
        idx = jnp.clip(n_min.astype(jnp.int32) - 1, 0, k - 1)
        return jnp.take(cum, idx) / jnp.maximum(n_min, 1.0)

    # lax.cond so the expensive top_k(P // 16) only executes when the fallback
    # branch is actually taken (jnp.where would evaluate both every call).
    return jax.lax.cond(n_hard >= n_min, _mean_hard, _mean_topk, None)


def _reference_ohem(logits_nchw, labels, *, thresh=0.7, ignore_index=255):
    """Pure-JAX reference mirroring the PyTorch semantics."""
    n, c, h, w = logits_nchw.shape
    p = n * h * w
    x = jnp.transpose(logits_nchw, (0, 2, 3, 1)).reshape(p, c).astype(jnp.float32)
    lab = labels.reshape(p).astype(jnp.int32)
    logp = jax.nn.log_softmax(x, axis=-1)
    picked = jnp.take_along_axis(logp, jnp.clip(lab, 0, c - 1)[:, None], axis=-1)[:, 0]
    valid = lab != ignore_index
    loss = jnp.where(valid, -picked, 0.0)
    t = -math.log(thresh)
    n_min = jnp.floor(jnp.sum(valid.astype(jnp.float32)) / 16.0)
    hard = loss > t
    n_hard = jnp.sum(hard.astype(jnp.float32))
    mean_hard = jnp.sum(jnp.where(hard, loss, 0.0)) / jnp.maximum(n_hard, 1.0)
    sd = jnp.sort(loss)[::-1]
    cum = jnp.cumsum(sd)
    idx = jnp.maximum(n_min.astype(jnp.int32) - 1, 0)
    mean_topk = jnp.take(cum, idx) / jnp.maximum(n_min, 1.0)
    return jnp.where(n_hard >= n_min, mean_hard, mean_topk)


if __name__ == "__main__":
    key = jax.random.PRNGKey(0)
    keys = jax.random.split(key, 6)

    def make_case(kl, kb, ki, n, c, h, w, ignore_frac=0.1):
        logits = jax.random.normal(kl, (n, c, h, w), dtype=jnp.float32)
        labels = jax.random.randint(kb, (n, h, w), 0, c, dtype=jnp.int32)
        ignore = jax.random.uniform(ki, (n, h, w)) < ignore_frac
        labels = jnp.where(ignore, 255, labels)
        return logits, labels

    # Case 1: default config (hard-example branch), f32 logits, int32 labels.
    logits1, labels1 = make_case(keys[0], keys[1], keys[2], 2, 4, 16, 16)
    out1 = jax.block_until_ready(ohem_ce_loss(logits1, labels1, thresh=0.7))
    ref1 = jax.block_until_ready(_reference_ohem(logits1, labels1, thresh=0.7))
    assert jnp.isfinite(out1), "non-finite OHEM loss (case 1)"
    assert jnp.allclose(out1, ref1, rtol=1e-5, atol=1e-5), (out1, ref1)

    # Case 2: bf16 logits + int16 labels, forced 128-pixel tile so multi-tile
    # accumulation and the two-way pixel split (v7x megacore path) are exercised.
    logits2 = logits1.astype(jnp.bfloat16)
    labels2 = labels1.astype(jnp.int16)
    out2 = jax.block_until_ready(ohem_ce_loss(logits2, labels2, thresh=0.7, tile_hw=128))
    ref2 = jax.block_until_ready(_reference_ohem(logits2, labels2, thresh=0.7))
    assert jnp.isfinite(out2), "non-finite OHEM loss (case 2)"
    assert jnp.allclose(out2, ref2, rtol=1e-5, atol=1e-5), (out2, ref2)

    # Case 3: H*W = 400 (not a multiple of the 384 tile) exercises the masked
    # tail tile plus the pixel split with N == 1.
    logits3, labels3 = make_case(keys[3], keys[4], keys[5], 1, 5, 10, 40)
    out3 = jax.block_until_ready(ohem_ce_loss(logits3, labels3, thresh=0.7))
    ref3 = jax.block_until_ready(_reference_ohem(logits3, labels3, thresh=0.7))
    assert jnp.isfinite(out3), "non-finite OHEM loss (case 3)"
    assert jnp.allclose(out3, ref3, rtol=1e-5, atol=1e-5), (out3, ref3)

    # Case 4: tiny thresh forces the top-k fallback branch (exercises lax.cond
    # gating and the bf16 per-pixel loss stream; looser tolerance due to bf16).
    out4 = jax.block_until_ready(ohem_ce_loss(logits1, labels1, thresh=0.001))
    ref4 = jax.block_until_ready(_reference_ohem(logits1, labels1, thresh=0.001))
    assert jnp.isfinite(out4), "non-finite OHEM loss (case 4)"
    assert jnp.allclose(out4, ref4, rtol=1e-2, atol=1e-2), (out4, ref4)

    print("KERNEL_OK")
</pallas_src>

<mosaic_0001>
module attributes {stable_mosaic.version = 11 : i64} {
  func.func @_ohem_ce_kernel(%arg0: i32, %arg1: i32, %arg2: i32, %arg3: memref<1x4x256xf32, #tpu.memory_space<vmem>>, %arg4: memref<1x1x256xi32, #tpu.memory_space<vmem>>, %arg5: memref<1x1x256xbf16, #tpu.memory_space<vmem>>, %arg6: memref<1x1x128xf32, #tpu.memory_space<vmem>>) attributes {dimension_semantics = [#tpu.dimension_semantics<parallel>, #tpu.dimension_semantics<parallel>, #tpu.dimension_semantics<arbitrary>], iteration_bounds = array<i64: 2, 1, 1>, scalar_prefetch = 0 : i64, scratch_operands = 0 : i64, tpu.core_type = #tpu.core_type<tc>, window_params = [{transform_indices = @transform_0, window_bounds = array<i64: 1, 4, 256>}, {transform_indices = @transform_1, window_bounds = array<i64: 1, 1, 256>}, {transform_indices = @transform_2, window_bounds = array<i64: 1, 1, 256>}, {transform_indices = @transform_3, window_bounds = array<i64: 1, 1, 128>}]} {
    %c0_i32 = arith.constant 0 : i32
    %0 = arith.cmpi eq, %arg2, %c0_i32 : i32
    %1 = arith.extui %0 : i1 to i32
    %c0_i32_0 = arith.constant 0 : i32
    %2 = arith.cmpi ne, %1, %c0_i32_0 : i32
    scf.if %2 {
      %cst_28 = arith.constant 0.000000e+00 : f32
      %65 = vector.broadcast %cst_28 : f32 to vector<1x1x128xf32>
      %c0_29 = arith.constant 0 : index
      %c0_30 = arith.constant 0 : index
      %c0_31 = arith.constant 0 : index
      %66 = vector.load %arg6[%c0_29, %c0_30, %c0_31] : memref<1x1x128xf32, #tpu.memory_space<vmem>>, vector<1x1x128xf32>
      tpu.vector_store %arg6[%c0_29, %c0_30, %c0_31], %65 {strides = array<i32>} : memref<1x1x128xf32, #tpu.memory_space<vmem>>, vector<1x1x128xf32>,
    } else {
    }
    %c0 = arith.constant 0 : index
    %c0_1 = arith.constant 0 : index
    %c0_2 = arith.constant 0 : index
    %3 = vector.load %arg3[%c0, %c0_1, %c0_2] : memref<1x4x256xf32, #tpu.memory_space<vmem>>, vector<1x4x256xf32>
    %c0_3 = arith.constant 0 : index
    %c0_4 = arith.constant 0 : index
    %c0_5 = arith.constant 0 : index
    %4 = vector.load %arg4[%c0_3, %c0_4, %c0_5] : memref<1x1x256xi32, #tpu.memory_space<vmem>>, vector<1x1x256xi32>
    %cst = arith.constant dense<0xFF800000> : vector<1x256xf32>
    %5 = vector.multi_reduction <maximumf>, %3, %cst [1] : vector<1x4x256xf32> to vector<1x256xf32>
    %6 = vector.shape_cast %5 : vector<1x256xf32> to vector<1x1x256xf32>
    %7 = vector.broadcast %6 : vector<1x1x256xf32> to vector<1x4x256xf32>
    %8 = arith.subf %3, %7 : vector<1x4x256xf32>
    %9 = math.exp %8 : vector<1x4x256xf32>
    %cst_6 = arith.constant dense<0.000000e+00> : vector<1x256xf32>
    %10 = vector.multi_reduction <add>, %9, %cst_6 [1] : vector<1x4x256xf32> to vector<1x256xf32>
    %11 = vector.shape_cast %10 : vector<1x256xf32> to vector<1x1x256xf32>
    %12 = tpu.iota {dimensions = array<i32: 1>} : vector<1x4x256xi32>
    %13 = vector.broadcast %4 : vector<1x1x256xi32> to vector<1x4x256xi32>
    %14 = arith.cmpi eq, %12, %13 : vector<1x4x256xi32>
    %cst_7 = arith.constant 0.000000e+00 : f32
    %15 = vector.broadcast %cst_7 : f32 to vector<1x4x256xf32>
    %16 = arith.select %14, %8, %15 : vector<1x4x256xi1>, vector<1x4x256xf32>
    %cst_8 = arith.constant dense<0.000000e+00> : vector<1x256xf32>
    %17 = vector.multi_reduction <add>, %16, %cst_8 [1] : vector<1x4x256xf32> to vector<1x256xf32>
    %18 = vector.shape_cast %17 : vector<1x256xf32> to vector<1x1x256xf32>
    %c255_i32 = arith.constant 255 : i32
    %19 = vector.broadcast %c255_i32 : i32 to vector<1x1x256xi32>
    %20 = arith.cmpi ne, %4, %19 : vector<1x1x256xi32>
    %21 = math.log %11 : vector<1x1x256xf32>
    %22 = arith.subf %21, %18 : vector<1x1x256xf32>
    %cst_9 = arith.constant 0.000000e+00 : f32
    %23 = vector.broadcast %cst_9 : f32 to vector<1x1x256xf32>
    %24 = arith.select %20, %22, %23 : vector<1x1x256xi1>, vector<1x1x256xf32>
    %25 = arith.truncf %24 : vector<1x1x256xf32> to vector<1x1x256xbf16>
    %c0_10 = arith.constant 0 : index
    %c0_11 = arith.constant 0 : index
    %c0_12 = arith.constant 0 : index
    %26 = vector.load %arg5[%c0_10, %c0_11, %c0_12] : memref<1x1x256xbf16, #tpu.memory_space<vmem>>, vector<1x1x256xbf16>
    tpu.vector_store %arg5[%c0_10, %c0_11, %c0_12], %25 {strides = array<i32>} : memref<1x1x256xbf16, #tpu.memory_space<vmem>>, vector<1x1x256xbf16>,
    %cst_13 = arith.constant 0.356674939 : f32
    %27 = vector.broadcast %cst_13 : f32 to vector<1x1x256xf32>
    %28 = arith.cmpf ogt, %24, %27 : vector<1x1x256xf32>
    %cst_14 = arith.constant 0.000000e+00 : f32
    %29 = vector.broadcast %cst_14 : f32 to vector<1x1x256xf32>
    %30 = arith.select %28, %24, %29 : vector<1x1x256xi1>, vector<1x1x256xf32>
    %cst_15 = arith.constant dense<0.000000e+00> : vector<1x1xf32>
    %31 = vector.multi_reduction <add>, %30, %cst_15 [2] : vector<1x1x256xf32> to vector<1x1xf32>
    %32 = vector.shape_cast %31 : vector<1x1xf32> to vector<1x1x1xf32>
    %33 = arith.extui %28 : vector<1x1x256xi1> to vector<1x1x256xi32>
    %34 = arith.sitofp %33 : vector<1x1x256xi32> to vector<1x1x256xf32>
    %cst_16 = arith.constant dense<0.000000e+00> : vector<1x1xf32>
    %35 = vector.multi_reduction <add>, %34, %cst_16 [2] : vector<1x1x256xf32> to vector<1x1xf32>
    %36 = vector.shape_cast %35 : vector<1x1xf32> to vector<1x1x1xf32>
    %37 = arith.extui %20 : vector<1x1x256xi1> to vector<1x1x256xi32>
    %38 = arith.sitofp %37 : vector<1x1x256xi32> to vector<1x1x256xf32>
    %cst_17 = arith.constant dense<0.000000e+00> : vector<1x1xf32>
    %39 = vector.multi_reduction <add>, %38, %cst_17 [2] : vector<1x1x256xf32> to vector<1x1xf32>
    %40 = vector.shape_cast %39 : vector<1x1xf32> to vector<1x1x1xf32>
    %41 = tpu.iota {dimensions = array<i32: 2>} : vector<1x1x128xi32>
    %c0_18 = arith.constant 0 : index
    %c0_19 = arith.constant 0 : index
    %c0_20 = arith.constant 0 : index
    %42 = vector.load %arg6[%c0_18, %c0_19, %c0_20] : memref<1x1x128xf32, #tpu.memory_space<vmem>>, vector<1x1x128xf32>
    %c0_i32_21 = arith.constant 0 : i32
    %43 = vector.broadcast %c0_i32_21 : i32 to vector<1x1x128xi32>
    %44 = arith.cmpi eq, %41, %43 : vector<1x1x128xi32>
    %cst_22 = arith.constant 0.000000e+00 : f32
    %45 = vector.shape_cast %32 : vector<1x1x1xf32> to vector<1x1x1xf32>
    %46 = vector.broadcast %45 : vector<1x1x1xf32> to vector<1x1x128xf32>
    %47 = vector.broadcast %cst_22 : f32 to vector<1x1x128xf32>
    %48 = arith.select %44, %46, %47 : vector<1x1x128xi1>, vector<1x1x128xf32>
    %c1_i32 = arith.constant 1 : i32
    %49 = vector.broadcast %c1_i32 : i32 to vector<1x1x128xi32>
    %50 = arith.cmpi eq, %41, %49 : vector<1x1x128xi32>
    %cst_23 = arith.constant 0.000000e+00 : f32
    %51 = vector.shape_cast %36 : vector<1x1x1xf32> to vector<1x1x1xf32>
    %52 = vector.broadcast %51 : vector<1x1x1xf32> to vector<1x1x128xf32>
    %53 = vector.broadcast %cst_23 : f32 to vector<1x1x128xf32>
    %54 = arith.select %50, %52, %53 : vector<1x1x128xi1>, vector<1x1x128xf32>
    %55 = arith.addf %48, %54 : vector<1x1x128xf32>
    %c2_i32 = arith.constant 2 : i32
    %56 = vector.broadcast %c2_i32 : i32 to vector<1x1x128xi32>
    %57 = arith.cmpi eq, %41, %56 : vector<1x1x128xi32>
    %cst_24 = arith.constant 0.000000e+00 : f32
    %58 = vector.shape_cast %40 : vector<1x1x1xf32> to vector<1x1x1xf32>
    %59 = vector.broadcast %58 : vector<1x1x1xf32> to vector<1x1x128xf32>
    %60 = vector.broadcast %cst_24 : f32 to vector<1x1x128xf32>
    %61 = arith.select %57, %59, %60 : vector<1x1x128xi1>, vector<1x1x128xf32>
    %62 = arith.addf %55, %61 : vector<1x1x128xf32>
    %63 = arith.addf %42, %62 : vector<1x1x128xf32>
    %c0_25 = arith.constant 0 : index
    %c0_26 = arith.constant 0 : index
    %c0_27 = arith.constant 0 : index
    %64 = vector.load %arg6[%c0_25, %c0_26, %c0_27] : memref<1x1x128xf32, #tpu.memory_space<vmem>>, vector<1x1x128xf32>
    tpu.vector_store %arg6[%c0_25, %c0_26, %c0_27], %63 {strides = array<i32>} : memref<1x1x128xf32, #tpu.memory_space<vmem>>, vector<1x1x128xf32>,
    return
  }
  func.func @transform_0(%arg0: i32, %arg1: i32, %arg2: i32) -> (i32, i32, i32) {
    %c1_i32 = arith.constant 1 : i32
    %0 = arith.muli %arg1, %c1_i32 : i32
    %1 = arith.addi %0, %arg2 : i32
    %c0_i32 = arith.constant 0 : i32
    %c0_i32_0 = arith.constant 0 : i32
    return %arg0, %c0_i32, %1 : i32, i32, i32
  }
  func.func @transform_1(%arg0: i32, %arg1: i32, %arg2: i32) -> (i32, i32, i32) {
    %c1_i32 = arith.constant 1 : i32
    %0 = arith.muli %arg1, %c1_i32 : i32
    %1 = arith.addi %0, %arg2 : i32
    %c0_i32 = arith.constant 0 : i32
    %c0_i32_0 = arith.constant 0 : i32
    return %arg0, %c0_i32, %1 : i32, i32, i32
  }
  func.func @transform_2(%arg0: i32, %arg1: i32, %arg2: i32) -> (i32, i32, i32) {
    %c1_i32 = arith.constant 1 : i32
    %0 = arith.muli %arg1, %c1_i32 : i32
    %1 = arith.addi %0, %arg2 : i32
    %c0_i32 = arith.constant 0 : i32
    %c0_i32_0 = arith.constant 0 : i32
    return %arg0, %c0_i32, %1 : i32, i32, i32
  }
  func.func @transform_3(%arg0: i32, %arg1: i32, %arg2: i32) -> (i32, i32, i32) {
    %c1_i32 = arith.constant 1 : i32
    %0 = arith.muli %arg0, %c1_i32 : i32
    %1 = arith.addi %0, %arg1 : i32
    %c0_i32 = arith.constant 0 : i32
    %c0_i32_0 = arith.constant 0 : i32
    %c0_i32_1 = arith.constant 0 : i32
    return %1, %c0_i32, %c0_i32_0 : i32, i32, i32
  }
}

</mosaic_0001>

<bundles_post_ra>
// kernel: tpu_custom_call.1
= control target key start
LH: loop header
LB: loop body
LE: loop exit
PB: predicated region body
PF: predicated region fallthrough
CT: control target
= control target key end

     0   :  { %9 = vsyncpa [#allocation3], 0  ;;  %s1171_s0 = inlined_call_operand.hbm [shape: f32[2,4,256], index: 0, kind: input, shape index: {}]   ;;  %s1172_s1 = inlined_call_operand.hbm [shape: s32[2,1,256], index: 1, kind: input, shape index: {}]   ;;  %s1173_s2 = inlined_call_operand.vmem [shape: bf16[2,1,256], index: 2, kind: output, shape index: {0}]   ;;  %s1174_s3 = inlined_call_operand.hbm [shape: f32[2,1,128], index: 3, kind: output, shape index: {1}]  }
   0x1   :  { %11 = vsyncpa [#allocation3 + $0x1], 0 }
   0x2   :  { %12 = vsyncpa [#allocation6], 0 }
   0x3   :  { %14 = vsyncpa [#allocation6 + $0x1], 0 }
   0x4   :  { %15 = vsyncpa [#allocation4], 0 }
   0x5   :  { %17 = vsyncpa [#allocation4 + $0x1], 0  ;;  %s941_s12 = smov 0   ;;  %s943_s13 = smov 0  }
   0x6   :  { %s945_s14 = smov 0   ;;  %s947_s15 = smov 0  }
   0x7   :  { %s949_s16 = smov 0   ;;  %s951_s17 = smov 0  }
   0x8 LB: > { %s676_s18 = sadd.s32 4294967295, %s914_s17   ;;  %s677_s19 = sadd.s32 4294967294, %s914_s17   ;;  %s914_s17 = sphi %s951_s17, %s23_s17   ;;  %s910_s16 = sphi %s949_s16, %s1190_s16   ;;  %s906_s15 = sphi %s947_s15, %s1189_s15   ;;  %s902_s14 = sphi %s945_s14, %s1188_s14   ;;  %s898_s13 = sphi %s943_s13, %s1187_s13   ;;  %s894_s12 = sphi %s941_s12, %s1186_s12  }
   0x9   : > { %s42_s20 = sadd.s32 1, %s910_s16  ;;  %s53_s21 = sadd.s32 1, %s902_s14 }
   0xa   : > { %p44_p0 = scmp.ge.s32.totalorder %s42_s20, 2  ;;  %p60_p1 = scmp.ne.s32.totalorder %s902_s14, %s898_s13 }
   0xb   : > { %p61_p2 = scmp.eq.s32.totalorder %s914_s17, 0  ;;  %p66_p3 = scmp.ne.s32.totalorder %s898_s13, %s894_s12 }
   0xc   : > { %s1192_s20 = smov (%p44_p0, %s42_s20), 0  ;;  %p67_p5 = scmp.eq.s32.totalorder %s676_s18, 0 }
   0xd   : > { %p982_p4 = por %p61_p2, %p60_p1  ;;  %s48_s23 = ssub.s32 %s910_s16, %s1192_s20 }
   0xe   : > { %p152_p6 = scmp.eq.s32.totalorder %s676_s18, 1  ;;  %p51_p7 = scmp.eq.s32.totalorder %s48_s23, 0 }
   0xf   : > { %p988_p8 = por %p67_p5, %p66_p3  ;;  %p158_p10 = scmp.eq.s32.totalorder %s677_s19, 1 }
  0x10   : > { %p992_p9 = por %p152_p6, %p60_p1  ;;  %p715_p13 = scmp.lt.s32.totalorder %s914_s17, 2 }
  0x11   : > { %s997_s26 = scalar_select %p51_p7, %s902_s14, %s53_s21  }
  0x12   : > { %p999_p11 = por %p158_p10, %p66_p3  ;;  %s1006_s28 = sand.u32 1, %s902_s14  }
  0x13   : > { %s680_s29 = sshll.u32 %s1006_s28, 3  ;;  %s696_s30 = sshll.u32 %s910_s16, 7 }
  0x14   : > { %s191_s6 = scalar_lea.hbm %s1171_s0, %s696_s30  ;;  %s182_s7 = scalar_lea.vmem [#allocation2], %s680_s29 }
  0x15   : > { %s193_s8 = sshll.u32 %s182_s7, 4  ;;  %p1015_p0 = pnand %p715_p13, %p982_p4  ;;  %s194_s8 = int_to_ptr.vmem [resolvable:$true] %s193_s8 }
  0x16   : > { %p686_p1 = scmp.ge.s32.totalorder %s914_s17, 1  ;;  %p220_p2 = scmp.lt.s32.totalorder %s914_s17, 3 }
  0x17   : > { %s179_s10 = scalar_lea.sflag [#allocation3], %s1006_s28  ;;  %p776_p3 = pneg %p1015_p0 }
  0x18   : > { %s787_s11 = scalar_lea.vmem %s194_s8, 128  ;;  %s916_s18 = smov [#allocation2]  }
  0x19   : > { %p788_p5 = scmp.ne.s32.totalorder %s194_s8, %s787_s11  ;;  %s792_s19 = sshll.u32 %s916_s18, 4  ;;  %s793_s19 = int_to_ptr.vmem [resolvable:$false] %s792_s19 }
  0x1a   : > { %s794_s21 = scalar_lea.vmem %s793_s19, 256  ;;  %p795_p4 = scmp.lt.s32.totalorder %s194_s8, %s793_s19 }
  0x1b   : > { %p790_p6 = pnand %p788_p5, %p776_p3  ;;  %p796_p10 = scmp.lt.s32.totalorder %s794_s21, %s787_s11 }
  0x1d   : > { %p791_p7 = pneg %p790_p6  ;;  %p797_p13 = por %p796_p10, %p795_p4 }
  0x1f   : > { %p798_p12 = pnand %p797_p13, %p791_p7 }
  0x21   : > { %801 = shalt.err (!%p798_p12)
}
  0x22   : > { %707 = dma.hbm_to_vmem [thread:$0]  (!%p1015_p0), %s191_s6, 128, %s194_s8, %s179_s10  }
  0x23   : > { %p1033_p5 = pnand %p686_p1, %p220_p2  ;;  %s683_s23 = sshll.u32 %s1006_s28, 1 }
  0x24   : > { %s697_s29 = sshll.u32 %s910_s16, 5  ;;  %s204_s7 = scalar_lea.vmem [#allocation5], %s683_s23 }
  0x25   : > { %s213_s5 = scalar_lea.hbm %s1172_s1, %s697_s29  ;;  %s215_s11 = sshll.u32 %s204_s7, 4  ;;  %s216_s11 = int_to_ptr.vmem [resolvable:$true] %s215_s11 }
  0x26   : > { %s201_s18 = scalar_lea.sflag [#allocation6], %s1006_s28  ;;  %s815_s19 = scalar_lea.vmem %s216_s11, 32 }
  0x27   : > { %p816_p12 = scmp.ne.s32.totalorder %s216_s11, %s815_s19  ;;  %s917_s6 = smov [#allocation5]  }
  0x28   : > { %s820_s8 = sshll.u32 %s917_s6, 4  ;;  %s821_s8 = int_to_ptr.vmem [resolvable:$false] %s820_s8 }
  0x29   : > { %p818_p6 = pnand %p816_p12, %p776_p3  ;;  %s822_s10 = scalar_lea.vmem %s821_s8, 64 }
  0x2a   : > { %p823_p1 = scmp.lt.s32.totalorder %s216_s11, %s821_s8  ;;  %p824_p2 = scmp.lt.s32.totalorder %s822_s10, %s815_s19 }
  0x2b   : > { %p819_p7 = pneg %p818_p6 }
  0x2c   : > { %p825_p4 = por %p824_p2, %p823_p1 }
  0x2e   : > { %p826_p10 = pnand %p825_p4, %p819_p7 }
  0x30   : > { %829 = shalt.err (!%p826_p10)
}
  0x31   : > { %710 = dma.hbm_to_vmem [thread:$0]  (!%p1015_p0), %s213_s5, 32, %s216_s11, %s201_s18  }
  0x32   : > { %224 = sbr.rel (%p1033_p5) target bundleno = 304 (0x130), region = 28  ;;  %s1051_s28 = sand.u32 (!%p1033_p5), 1, %s898_s13  }
  0x33   : > { %s687_s21 = sshll.u32 (!%p1033_p5), %s1051_s28, 3  ;;  %s227_s23 = scalar_lea.sflag (!%p1033_p5), [#allocation3], %s1051_s28 }
  0x34   : > { %s230_s29 = scalar_lea.vmem (!%p1033_p5), [#allocation2], %s687_s21 }
  0x37   : > { %881 = dma.done.wait (%p988_p8), %s227_s23, 128  }
  0x38   : > { %883 = vsyncadd (%p988_p8), %s227_s23, 4294967168  ;;  %s688_s9 = sshll.u32 %s1051_s28, 1  ;;  %s236_s22 = scalar_lea.sflag [#allocation6], %s1051_s28 }
  0x39   : > { %s239_s30 = scalar_lea.vmem [#allocation5], %s688_s9 }
  0x3a   : > { %885 = dma.done.wait (%p988_p8), %s236_s22, 32  }
  0x3b   : > { %887 = vsyncadd (%p988_p8), %s236_s22, 4294967264  ;;  %v340_v0 = vlaneseq  ;;  %vm301_vm0 = vcmask 1043456   ;;  %v296_v2 = vld [vmem:[%s230_s29] sm:$0xff]  ;;  %v1068_v3 = vld [vmem:[%s239_s30] sm:$0x3]  ;;  %v918_v10 = vmov 0.0  }
  0x3c   : > { %v299_v4 = vcombine.high %v296_v2, %v296_v2  ;;  %v302_v5 = vsel %vm301_vm0, %v296_v2, -inf  ;;  %vm371_vm1 = vcmp.ne.s32.totalorder %v1068_v3, 255  ;;  %vm428_vm2 = vcmask 1040384   ;;  %p281_p8 = scmp.lt.s32.totalorder %s906_s15, 1  ;;  %s274_s18 = scalar_lea.vmem [#allocation7], %s1051_s28 }
  0x3d   : > { %v1066_v1 = vshrl.u32 %v340_v0, 7  ;;  %v303_v6 = vrot.slane %v302_v5, 4  ;;  %v692_v11 = vsel %vm371_vm1, 1.0, %v918_v10  ;;  %vm429_vm5 = vsmask.f32 256  ;;  %295 = vst [vmem:[%s274_s18] sm:$0x1] %v918_v10 }
  0x3e   : > { %v309_v9 = vsel %vm301_vm0, %v299_v4, -inf  ;;  %s282_s24 = scalar_select %p281_p8, %s906_s15, 1  ;;  %vm431_vm6 = vcmask 1041409   ;;  %vm432_vm7 = vsmask.f32 1280  ;;  %vm1104_vm9 = vmand %vm428_vm2, %vm429_vm5 }
  0x3f   : > { %v1072_v7 = vsub.s32 0, %v1066_v1  ;;  %v1075_v8 = vsub.s32 1, %v1066_v1  ;;  %v304_v12 = vmax.f32 %v302_v5, %v303_v6  ;;  %v310_v13 = vrot.slane %v309_v9, 4  ;;  %vm1112_vm10 = vmand %vm431_vm6, %vm432_vm7  ;;  %s693_s19 = sshll.u32 %s906_s15, 4  ;;  %s534_s6 = sshll.u32 %s274_s18, 4  ;;  %s535_s6 = int_to_ptr.vmem [resolvable:$true] %s534_s6 }
  0x40   : > { %s689_s4 = sshll.u32 %s282_s24, 1  ;;  %vm434_vm11 = vmor %vm1112_vm10, %vm1104_vm9  ;;  %s532_s21 = scalar_lea.hbm %s1174_s3, %s693_s19 }
  0x41   : > { %v481_v14 = vrot.slane %v692_v11, %v1072_v7  ;;  %v485_v15 = vrot.slane %v692_v11, %v1075_v8  ;;  %v305_v16 = vrot.slane %v304_v12, 2  ;;  %v311_v17 = vmax.f32 %v309_v9, %v310_v13  ;;  %s287_s11 = scalar_lea.vmem %s1173_s2, %s689_s4  ;;  %s516_s23 = scalar_lea.sflag [#allocation4], %s1051_s28 }
  0x42   : > { %v345_v31 = vrot.slane %v1068_v3, %v1072_v7  ;;  %v349_v32 = vrot.slane %v1068_v3, %v1075_v8  ;;  %s830_s29 = scalar_lea.vmem %s535_s6, 16  ;;  %s920_s9 = smov [#allocation7]  }
  0x43   : > { %v488_v18 = vsel %vm428_vm2, %v481_v14, 0.0  ;;  %v489_v19 = vsel %vm428_vm2, %v485_v15, 0.0  ;;  %v306_v21 = vmax.f32 %v304_v12, %v305_v16  ;;  %v312_v22 = vrot.slane %v311_v17, 2  ;;  %p831_p0 = scmp.ne.s32.totalorder %s535_s6, %s830_s29  ;;  %s834_s22 = sshll.u32 %s920_s9, 4  ;;  %s835_s22 = int_to_ptr.vmem [resolvable:$false] %s834_s22 }
  0x44   : > { %v490_v20 = vadd.f32 %v489_v19, %v488_v18  ;;  %vm350_vm3 = vcmp.eq.s32.totalorder %v1066_v1, %v345_v31  ;;  %vm351_vm4 = vcmp.eq.s32.totalorder %v1066_v1, %v349_v32  ;;  %s836_s30 = scalar_lea.vmem %s835_s22, 32  ;;  %p837_p5 = scmp.lt.s32.totalorder %s535_s6, %s835_s22 }
  0x45   : > { %v307_v23 = vrot.slane %v306_v21, 1  ;;  %v313_v24 = vmax.f32 %v311_v17, %v312_v22  ;;  %p832_p3 = pnand %p831_p0, %p992_p9  ;;  %p838_p12 = scmp.lt.s32.totalorder %s836_s30, %s830_s29 }
  0x46   : > { %491 = vadd.xlane.f32.xlu1 %v490_v20 }
  0x47   : > { %v308_v25 = vmax.f32 %v306_v21, %v307_v23  ;;  %v314_v26 = vrot.slane %v313_v24, 1  ;;  %p833_p13 = pneg %p832_p3  ;;  %p839_p6 = por %p838_p12, %p837_p5 }
  0x49   : > { %v315_v27 = vmax.f32 %v313_v24, %v314_v26  ;;  %p840_p7 = pnand %p839_p6, %p833_p13 }
  0x4b   : > { %v318_v28 = vcombine.low %v308_v25, %v315_v27 }
  0x4d   : > { %v320_v29 = vsub.f32 %v296_v2, %v318_v28  ;;  %v919_v2 = vmov 1966171168  }
  0x4e   : > { %v382_v4 = vunpack.c.l.s4 %v919_v2 }
  0x4f   : > { %v321_v30 = vmul.f32 1.442695, %v320_v29  ;;  %v353_v33 = vcombine.high %v320_v29, %v320_v29  ;;  %v355_v35 = vsel %vm350_vm3, %v320_v29, 0.0 }
  0x50   : > { %v357_v41 = vsel %vm301_vm0, %v355_v35, 0.0  ;;  %v383_v12 = vunpack.c.0.s8 %v382_v4  ;;  %v435_v35 = vld [vmem:[%s287_s11] sm:$0x3] }
  0x51   : > { %768 = vpow2.f32 %v321_v30  ;;  %v356_v39 = vsel %vm351_vm4, %v353_v33, 0.0  ;;  %v358_v47 = vrot.slane %v357_v41, 4 }
  0x52   : > { %v364_v44 = vsel %vm301_vm0, %v356_v39, 0.0  ;;  %v386_v17 = vsub.s32 %v383_v12, %v1066_v1  ;;  %v494_v39 = vand.u32 127, %v340_v0 }
  0x53   : > { %v365_v50 = vrot.slane %v364_v44, 4  ;;  %v359_v53 = vadd.f32 %v358_v47, %v357_v41  ;;  %v495_v47 = vld [vmem:[%s274_s18] sm:$0x1] }
  0x54   : > { %vm496_vm12 = vcmp.eq.s32.totalorder %v494_v39, 0  ;;  %vm498_vm13 = vcmp.eq.s32.totalorder %v494_v39, 1  ;;  %vm501_vm14 = vcmp.eq.s32.totalorder %v494_v39, 2 }
  0x55   : > { %v366_v56 = vadd.f32 %v365_v50, %v364_v44  ;;  %v360_v58 = vrot.slane %v359_v53, 2 }
  0x57   : > { %v367_v59 = vrot.slane %v366_v56, 2  ;;  %v361_v60 = vadd.f32 %v360_v58, %v359_v53 }
  0x59   : > { %v368_v61 = vadd.f32 %v367_v59, %v366_v56  ;;  %v362_v62 = vrot.slane %v361_v60, 1 }
  0x5b   : > { %v369_v63 = vrot.slane %v368_v61, 1  ;;  %v363_v5 = vadd.f32 %v362_v62, %v361_v60 }
  0x5d   : > { %v370_v9 = vadd.f32 %v369_v63, %v368_v61 }
  0x5e   : > { %v769_v34 = vpop.eup %768 }
  0x5f   : > { %v324_v36 = vcombine.high %v769_v34, %v769_v34  ;;  %v326_v37 = vsel %vm301_vm0, %v769_v34, 0.0 }
  0x60   : > { %v327_v38 = vrot.slane %v326_v37, 4 }
  0x61   : > { %v333_v40 = vsel %vm301_vm0, %v324_v36, 0.0 }
  0x62   : > { %v328_v42 = vadd.f32 %v327_v38, %v326_v37  ;;  %v334_v43 = vrot.slane %v333_v40, 4 }
  0x64   : > { %v329_v45 = vrot.slane %v328_v42, 2  ;;  %v335_v46 = vadd.f32 %v334_v43, %v333_v40 }
  0x66   : > { %v330_v48 = vadd.f32 %v329_v45, %v328_v42  ;;  %v336_v49 = vrot.slane %v335_v46, 2 }
  0x68   : > { %v331_v51 = vrot.slane %v330_v48, 1  ;;  %v337_v52 = vadd.f32 %v336_v49, %v335_v46 }
  0x6a   : > { %v332_v54 = vadd.f32 %v331_v51, %v330_v48  ;;  %v338_v55 = vrot.slane %v337_v52, 1 }
  0x6c   : > { %v339_v57 = vadd.f32 %v338_v55, %v337_v52  ;;  %770 = vlog2.f32 %v332_v54 }
  0x6e   : > { %772 = vlog2.f32 %v339_v57 }
  0x79   : > { %v771_v6 = vpop.eup %770 }
  0x7a   : > { %v373_v11 = vmul.f32 0.6931472, %v771_v6 }
  0x7b   : > { %v773_v13 = vpop.eup %772 }
  0x7c   : > { %v375_v14 = vmul.f32 0.6931472, %v773_v13  ;;  %v376_v15 = vsub.f32 %v373_v11, %v363_v5 }
  0x7e   : > { %v377_v16 = vsub.f32 %v375_v14, %v370_v9 }
  0x80   : > { %v380_v18 = vcombine.low %v376_v15, %v377_v16 }
  0x82   : > { %v387_v19 = vrot.slane %v380_v18, %v386_v17 }
  0x84   : > { %v394_v20 = vrot.slane %v387_v19, %v386_v17 }
  0x86   : > { %v396_v21 = vsel %vm371_vm1, %v394_v20, 0.0 }
  0x87   : > { %vm438_vm8 = vcmp.gt.f32.partialorder %v396_v21, 0.35667494  ;;  %v401_v22 = vrot.slane %v396_v21, %v1072_v7  ;;  %v405_v23 = vrot.slane %v396_v21, %v1075_v8 }
  0x88   : > { %v439_v1 = vsel %vm438_vm8, %v396_v21, 0.0  ;;  %v691_v25 = vsel %vm438_vm8, 1.0, %v918_v10 }
  0x89   : > { %v444_v26 = vrot.slane %v439_v1, %v1072_v7  ;;  %v448_v27 = vrot.slane %v439_v1, %v1075_v8  ;;  %v690_v28 = vpack.c.bf16 %v405_v23, %v401_v22  ;;  %v463_v29 = vrot.slane %v691_v25, %v1072_v7 }
  0x8a   : > { %v467_v30 = vrot.slane %v691_v25, %v1075_v8 }
  0x8b   : > { %v452_v31 = vsel %vm428_vm2, %v444_v26, 0.0  ;;  %v453_v32 = vsel %vm428_vm2, %v448_v27, 0.0  ;;  %v419_v33 = vrot.slane %v690_v28, %v386_v17  ;;  %v470_v34 = vsel %vm428_vm2, %v463_v29, 0.0 }
  0x8c   : > { %v454_v36 = vadd.f32 %v453_v32, %v452_v31  ;;  %v471_v37 = vsel %vm428_vm2, %v467_v30, 0.0 }
  0x8d   : > { %v426_v7 = vrot.slane %v419_v33, %v386_v17  ;;  %v472_v38 = vadd.f32 %v471_v37, %v470_v34 }
  0x8e   : > { %455 = vadd.xlane.f32.xlu0 %v454_v36 }
  0x8f   : > { %v436_v8 = vsel %vm434_vm11, %v426_v7, %v435_v35 }
  0x90   : > { %437 = vst [vmem:[%s287_s11] sm:$0x3] %v436_v8 }
  0x92   : > { %473 = vadd.xlane.f32.xlu0 %v472_v38 }
  0xcf   : > { %v492_v41 = vpop.xlane.xlu1 %491 }
  0xd0   : > { %v502_v45 = vsel %vm501_vm14, %v492_v41, 0.0 }
 0x117   : > { %v456_v40 = vpop.xlane.xlu0 %455 }
 0x118   : > { %v497_v43 = vsel %vm496_vm12, %v456_v40, 0.0 }
 0x11b   : > { %v474_v42 = vpop.xlane.xlu0 %473 }
 0x11c   : > { %v499_v44 = vsel %vm498_vm13, %v474_v42, 0.0 }
 0x11d   : > { %v500_v46 = vadd.f32 %v499_v44, %v497_v43 }
 0x11f   : > { %v503_v48 = vadd.f32 %v502_v45, %v500_v46 }
 0x121   : > { %v504_v49 = vadd.f32 %v503_v48, %v495_v47 }
 0x123   : > { %505 = vst [vmem:[%s274_s18] sm:$0x1] %v504_v49 }
 0x124   : > { %843 = shalt.err (!%p840_p7)
}
 0x125   : > { %s844_s15 = scalar_lea.hbm %s532_s21, 16  ;;  %s848_s4 = scalar_lea.hbm %s1174_s3, 32 }
 0x126   : > { %p845_p1 = scmp.ne.s32.totalorder %s532_s21, %s844_s15  ;;  %p849_p10 = scmp.lt.s32.totalorder %s532_s21, %s1174_s3 }
 0x127   : > { %p850_p8 = scmp.lt.s32.totalorder %s848_s4, %s844_s15 }
 0x128   : > { %p846_p2 = pnand %p845_p1, %p992_p9 }
 0x129   : > { %p851_p0 = por %p850_p8, %p849_p10 }
 0x12a   : > { %p847_p4 = pneg %p846_p2 }
 0x12c   : > { %p852_p3 = pnand %p851_p0, %p847_p4 }
 0x12e   : > { %855 = shalt.err (!%p852_p3)
}
 0x12f   : > { %702 = dma.vmem_to_hbm [thread:$0]  (%p992_p9), %s535_s6, 16, %s532_s21, %s516_s23  }
 0x130 PF: > { %s558_s11 = sand.u32 1, %s894_s12   ;;  %p1185_p13 = scmp.ge.s32.totalorder %s914_s17, 2 }
 0x131   : > { %s559_s18 = scalar_lea.sflag [#allocation4], %s558_s11 }
 0x132   : > { %p712_p5 = pnand %p1185_p13, %p999_p11 }
 0x134   : > { %p713_p12 = pneg %p712_p5 }
 0x136   : > { %889 = dma.done.wait (%p713_p12), %s559_s18, 16  }
 0x137   : > { %891 = vsyncadd (%p713_p12), %s559_s18, 4294967280  ;;  %s23_s17 = sadd.s32 1, %s914_s17   ;;  %s1186_s12 = smov %s898_s13 }
 0x138   : > { %p20_p6 = scmp.ge.s32.totalorder %s23_s17, 4   ;;  %s1187_s13 = smov %s902_s14 }
 0x139   : > { %s1188_s14 = smov %s997_s26  ;;  %s1189_s15 = smov %s910_s16 }
 0x13a   : > { %s1190_s16 = smov %s1192_s20  ;;  %22 = sbr.rel (!%p20_p6) target bundleno = 8 (0x8), region = 102 }
 0x13f   :  { %563 = vsyncpa [#allocation3], 1 }
 0x140   :  { %565 = vsyncpa [#allocation3 + $0x1], 1 }
 0x141   :  { %566 = vsyncpa [#allocation6], 1 }
 0x142   :  { %568 = vsyncpa [#allocation6 + $0x1], 1 }
 0x143   :  { %569 = vsyncpa [#allocation4], 1 }
 0x144   :  { %571 = vsyncpa [#allocation4 + $0x1], 1 }

</bundles_post_ra>
